<compile_context>
chip_gen: v7x
topology: tpu7x:2x2x1
jax: 0.10.0
libtpu: 0.0.40
codegen_flags: <defaults>
</compile_context>

<pallas_src>
import functools
import numpy as np

import jax
import jax.numpy as jnp
from jax import lax
from jax.experimental import pallas as pl
from jax.experimental.pallas import tpu as pltpu

# ----------------------------- config ---------------------------------------
EPSILON = 1e-4          # model_cfg EPSILON
EPSILON_ANGLE = 1e-4    # model_cfg EPSILON_ANGLE
W_SCALE = 100.0
ANGLE_SCALE = 100.0
EPS_HIT = 1e-3          # tolerance of the "is the point inside the mesh" test
CHUNK = 128             # lane sub-chunk inside the kernel
MAX_CHUNKS_PER_TILE = 32  # point tile up to 32*128 = 4096 lanes per grid step


# --------------------------- synthetic mesh ---------------------------------
def build_mesh(G=5):
    """Regular G x G grid over [-1,1]^2, split into triangles (deterministic)."""
    lin = np.linspace(-1.0, 1.0, G).astype(np.float32)
    xs, ys = np.meshgrid(lin, lin, indexing="ij")
    vertices = np.stack([xs.ravel(), ys.ravel()], axis=1).astype(np.float32)

    def vid(i, j):
        return i * G + j

    faces = []
    for i in range(G - 1):
        for j in range(G - 1):
            v00, v01 = vid(i, j), vid(i, j + 1)
            v10, v11 = vid(i + 1, j), vid(i + 1, j + 1)
            faces.append([v00, v10, v11])
            faces.append([v00, v11, v01])
    faces = np.array(faces, np.int32)

    eset = set()
    for f in faces:
        for a, b in [(f[0], f[1]), (f[1], f[2]), (f[2], f[0])]:
            eset.add((min(a, b), max(a, b)))
    und = sorted(eset)
    edges = np.array([[a, b] for a, b in und] + [[b, a] for a, b in und],
                     np.int32).T                              # [2, E] directed

    # boundary verts ordered CCW around the perimeter
    bound = []
    for i in range(G - 1):
        bound.append(vid(i, 0))
    for j in range(G - 1):
        bound.append(vid(G - 1, j))
    for i in range(G - 1, 0, -1):
        bound.append(vid(i, G - 1))
    for j in range(G - 1, 0, -1):
        bound.append(vid(0, j))
    bound = np.array(bound, np.int32)
    interior = np.array(
        [vid(i, j) for i in range(1, G - 1) for j in range(1, G - 1)], np.int32)

    return dict(vertices=vertices, faces=faces, edges=edges,
                bound_verts=bound, interior_verts=interior)


# ----------------------------- fused Pallas kernel ---------------------------
def tutte_fused_kernel(pts_ref, coef_ref, table_ref, out_ref, *,
                       num_faces_pad, num_chunks, unroll):
    """Fused point-in-triangle search + barycentric interp + distortion pick.

    pts_ref  : [8, TB]      f32  rows: x, y, 1, 0, 0, 0, 0, 0  (homogeneous slab)
    coef_ref : [3*Fp, 8]    f32  static barycentric coefficients; rows
                                 [0:Fp)->l1, [Fp:2Fp)->l2, [2Fp:3Fp)->l3
    table_ref: [8, 4*Fp]    f32  per-batch pick table (built in the wrapper)
    out_ref  : [8, TB]      f32  rows: pred_x pred_y M00 M01 M10 M11 hit fid
    """
    Fp = num_faces_pad
    coef = coef_ref[...]          # hoisted: loop invariant
    table = table_ref[...]        # hoisted: loop invariant
    fidx = lax.broadcasted_iota(jnp.int32, (Fp, CHUNK), 0)
    miss = jnp.int32(Fp)

    def body(c, carry):
        col = pl.multiple_of(c * CHUNK, CHUNK)
        slab = pts_ref[:, pl.ds(col, CHUNK)]                       # [8, CHUNK]

        # --- barycentric coords of EVERY face for every point: one MXU matmul
        lam = jnp.dot(coef, slab, preferred_element_type=jnp.float32)  # [3Fp,C]
        l1 = lam[0:Fp]
        l2 = lam[Fp:2 * Fp]
        l3 = lam[2 * Fp:3 * Fp]

        # --- containing face = argmax of min barycentric coordinate
        #     (ties broken toward the lowest face index)
        score = jnp.minimum(jnp.minimum(l1, l2), l3)                # [Fp, C]
        best_score = jnp.max(score, axis=0, keepdims=True)          # [1, C] (XLU)
        cand = jnp.where(score == best_score, fidx, miss)
        best_idx = jnp.min(cand, axis=0, keepdims=True)             # [1, C] (XLU)
        is_hit = best_score >= -EPS_HIT                             # [1, C]
        sel = (fidx == best_idx) & is_hit                           # one-hot
        self_f = sel.astype(jnp.float32)

        # --- ALL per-point gathers as ONE MXU contraction:
        #     mask_stack rows: [sel | sel*l1 | sel*l2 | sel*l3]
        mask_stack = jnp.concatenate(
            [self_f, self_f * l1, self_f * l2, self_f * l3], axis=0)  # [4Fp, C]
        out_ref[:, pl.ds(col, CHUNK)] = jnp.dot(
            table, mask_stack, preferred_element_type=jnp.float32)    # [8, C]
        return carry

    lax.fori_loop(0, num_chunks, body, None, unroll=unroll)


def run_tutte_fused(pts_h, coef, table, tb):
    """pts_h: [B, 8, P_pad], coef: [3*Fp, 8], table: [B, 8, 4*Fp]."""
    B, _, P_pad = pts_h.shape
    Fp3 = coef.shape[0]
    Fp = Fp3 // 3
    num_chunks = tb // CHUNK
    unroll = max(1, min(4, num_chunks))
    kern = functools.partial(tutte_fused_kernel, num_faces_pad=Fp,
                             num_chunks=num_chunks, unroll=unroll)
    return pl.pallas_call(
        kern,
        out_shape=jax.ShapeDtypeStruct((B, 8, P_pad), jnp.float32),
        grid=(B, P_pad // tb),
        in_specs=[pl.BlockSpec((None, 8, tb), lambda b, i: (b, 0, i)),
                  pl.BlockSpec((Fp3, 8), lambda b, i: (0, 0)),
                  pl.BlockSpec((None, 8, 4 * Fp), lambda b, i: (b, 0, 0))],
        out_specs=pl.BlockSpec((None, 8, tb), lambda b, i: (b, 0, i)),
        compiler_params=pltpu.CompilerParams(
            dimension_semantics=("parallel", "parallel")),
    )(pts_h, coef, table)


# ----------------------------- forward (glue + fused kernel) -----------------
def make_forward(mesh):
    vertices_np = mesh["vertices"].astype(np.float64)   # [nv, 2]
    faces_np = mesh["faces"]                             # [F, 3]
    edges_np = mesh["edges"]                             # [2, E] directed
    bound_np = mesh["bound_verts"]
    interior_np = mesh["interior_verts"]

    E = int(edges_np.shape[1])
    nb = int(bound_np.shape[0])
    ni = int(interior_np.shape[0])
    n_vert = int(vertices_np.shape[0])
    F = int(faces_np.shape[0])
    F_pad = -(-F // 8) * 8                               # sublane-aligned faces

    # ---- host precompute: barycentric coefficient matrix (f64 -> f32) -------
    Av = vertices_np[faces_np[:, 0]]
    Bv = vertices_np[faces_np[:, 1]]
    Cv = vertices_np[faces_np[:, 2]]
    d = (Av[:, 0] - Cv[:, 0]) * (Bv[:, 1] - Cv[:, 1]) \
        - (Bv[:, 0] - Cv[:, 0]) * (Av[:, 1] - Cv[:, 1])
    inv_d = 1.0 / d   # exact host divide (mesh is non-degenerate)
    a1x = (Bv[:, 1] - Cv[:, 1]) * inv_d
    a1y = (Cv[:, 0] - Bv[:, 0]) * inv_d
    a1c = -(a1x * Cv[:, 0] + a1y * Cv[:, 1])
    a2x = (Cv[:, 1] - Av[:, 1]) * inv_d
    a2y = (Av[:, 0] - Cv[:, 0]) * inv_d
    a2c = -(a2x * Cv[:, 0] + a2y * Cv[:, 1])
    a3x = -(a1x + a2x)
    a3y = -(a1y + a2y)
    a3c = 1.0 - a1c - a2c

    coef_np = np.zeros((3 * F_pad, 8), np.float32)
    coef_np[0:F, 0] = a1x; coef_np[0:F, 1] = a1y; coef_np[0:F, 2] = a1c
    coef_np[F:F_pad, 2] = -1e9            # padded faces can never be selected
    coef_np[F_pad:F_pad + F, 0] = a2x
    coef_np[F_pad:F_pad + F, 1] = a2y
    coef_np[F_pad:F_pad + F, 2] = a2c
    coef_np[2 * F_pad:2 * F_pad + F, 0] = a3x
    coef_np[2 * F_pad:2 * F_pad + F, 1] = a3y
    coef_np[2 * F_pad:2 * F_pad + F, 2] = a3c

    # inverse of the original-triangle edge matrix E = [B-A | C-A]
    e1 = Bv - Av
    e2 = Cv - Av
    invdet = 1.0 / (e1[:, 0] * e2[:, 1] - e2[:, 0] * e1[:, 1])
    g00_np = (e2[:, 1] * invdet).astype(np.float32)
    g01_np = (-e1[:, 1] * invdet).astype(np.float32)
    g10_np = (-e2[:, 0] * invdet).astype(np.float32)
    g11_np = (e1[:, 0] * invdet).astype(np.float32)

    # ---- host precompute: Laplacian block scatter indices --------------------
    inter_map = -np.ones(n_vert, np.int32)
    inter_map[interior_np] = np.arange(ni, dtype=np.int32)
    bound_map = -np.ones(n_vert, np.int32)
    bound_map[bound_np] = np.arange(nb, dtype=np.int32)

    src, dst = edges_np[0], edges_np[1]
    int_src = inter_map[src] >= 0
    deg_e = np.nonzero(int_src)[0].astype(np.int32)
    deg_r = inter_map[src[int_src]]
    m_ii = int_src & (inter_map[dst] >= 0)
    ii_e = np.nonzero(m_ii)[0].astype(np.int32)
    ii_r = inter_map[src[m_ii]]
    ii_c = inter_map[dst[m_ii]]
    m_ib = int_src & (bound_map[dst] >= 0)
    ib_e = np.nonzero(m_ib)[0].astype(np.int32)
    ib_r = inter_map[src[m_ib]]
    ib_c = bound_map[dst[m_ib]]

    # device constants
    coef_j = jnp.asarray(coef_np)
    g00_j = jnp.asarray(g00_np); g01_j = jnp.asarray(g01_np)
    g10_j = jnp.asarray(g10_np); g11_j = jnp.asarray(g11_np)
    faces_j = jnp.asarray(faces_np)
    bound_j = jnp.asarray(bound_np)
    interior_j = jnp.asarray(interior_np)
    deg_e_j, deg_r_j = jnp.asarray(deg_e), jnp.asarray(deg_r)
    ii_e_j, ii_r_j, ii_c_j = jnp.asarray(ii_e), jnp.asarray(ii_r), jnp.asarray(ii_c)
    ib_e_j, ib_r_j, ib_c_j = jnp.asarray(ib_e), jnp.asarray(ib_r), jnp.asarray(ib_c)

    @jax.jit
    def forward(input_points, var_pred):
        B, N, _ = input_points.shape
        vp = var_pred.astype(jnp.float32)

        # ---- 1) activations (plain jnp; XLA fuses with the boundary map) ---
        W_var = jax.nn.sigmoid(vp[:, :E] * (1.0 / W_SCALE)) \
            * (1.0 - 2.0 * EPSILON) + EPSILON
        angle_var = jax.nn.sigmoid(vp[:, E:E + nb] * (1.0 / ANGLE_SCALE)) \
            * (1.0 - 2.0 * EPSILON_ANGLE) + EPSILON_ANGLE

        # ---- 2) boundary positions on the unit square -----------------------
        new_angle = angle_var / jnp.sum(angle_var, axis=1, keepdims=True)
        a = jnp.cumsum(new_angle, axis=1) * (2.0 * jnp.pi)
        pi = jnp.pi
        m1 = (a > 7 * pi / 4) | (a <= pi / 4)
        m2 = (a > pi / 4) & (a <= 3 * pi / 4)
        m3 = (a > 3 * pi / 4) & (a <= 5 * pi / 4)
        m4 = (a > 5 * pi / 4) & (a <= 7 * pi / 4)
        ta = jnp.tan(a)
        bpx = (jnp.where(m1, 1.0, 0.0) + jnp.where(m2, 1.0 / ta, 0.0)
               + jnp.where(m3, -1.0, 0.0) + jnp.where(m4, -1.0 / ta, 0.0))
        bpy = (jnp.where(m1, ta, 0.0) + jnp.where(m2, 1.0, 0.0)
               + jnp.where(m3, -ta, 0.0) + jnp.where(m4, -1.0, 0.0))
        bound_pos = jnp.stack([bpx, bpy], axis=-1)          # [B, nb, 2]

        # ---- 3) Tutte embedding: interior blocks only + dense solve --------
        # TODO(synk): original uses a sparse COO double-precision solve; here
        # only L_II / L_IB are assembled and solved densely in fp32.
        def build_blocks(w):
            L_II = (jnp.zeros((ni, ni), jnp.float32)
                    .at[deg_r_j, deg_r_j].add(w[deg_e_j])
                    .at[ii_r_j, ii_c_j].add(-w[ii_e_j]))
            L_IB = jnp.zeros((ni, nb), jnp.float32).at[ib_r_j, ib_c_j].add(-w[ib_e_j])
            return L_II, L_IB
        L_II, L_IB = jax.vmap(build_blocks)(W_var)
        b_rhs = -jnp.einsum("bij,bjc->bic", L_IB, bound_pos)
        x_int = jnp.linalg.solve(L_II, b_rhs)
        new_vertices = (jnp.zeros((B, n_vert, 2), jnp.float32)
                        .at[:, bound_j, :].set(bound_pos)
                        .at[:, interior_j, :].set(x_int))

        # ---- 4) per-batch pick table [B, 8, 4*F_pad] for the kernel ---------
        new_tri = new_vertices[:, faces_j, :]                # [B, F, 3, 2]
        nA = new_tri[:, :, 0, :]
        nB = new_tri[:, :, 1, :]
        nC = new_tri[:, :, 2, :]
        f1 = nB - nA
        f2 = nC - nA
        M00 = f1[..., 0] * g00_j + f2[..., 0] * g01_j
        M01 = f1[..., 0] * g10_j + f2[..., 0] * g11_j
        M10 = f1[..., 1] * g00_j + f2[..., 1] * g01_j
        M11 = f1[..., 1] * g10_j + f2[..., 1] * g11_j

        zf = jnp.zeros((B, F_pad), jnp.float32)

        def padF(x):
            return jnp.pad(x, ((0, 0), (0, F_pad - F)))

        rows = [
            # pred_x / pred_y come from the (sel*l1, sel*l2, sel*l3) blocks
            jnp.concatenate([zf, padF(nA[..., 0]), padF(nB[..., 0]),
                             padF(nC[..., 0])], axis=1),
            jnp.concatenate([zf, padF(nA[..., 1]), padF(nB[..., 1]),
                             padF(nC[..., 1])], axis=1),
            # distortion matrix, hit flag and face id come from the sel block
            jnp.concatenate([padF(M00), zf, zf, zf], axis=1),
            jnp.concatenate([padF(M01), zf, zf, zf], axis=1),
            jnp.concatenate([padF(M10), zf, zf, zf], axis=1),
            jnp.concatenate([padF(M11), zf, zf, zf], axis=1),
            jnp.concatenate([jnp.ones((B, F_pad), jnp.float32), zf, zf, zf], axis=1),
            jnp.concatenate([jnp.broadcast_to(
                jnp.arange(F_pad, dtype=jnp.float32)[None, :], (B, F_pad)),
                zf, zf, zf], axis=1),
        ]
        table = jnp.stack(rows, axis=1)                      # [B, 8, 4*F_pad]

        # ---- 5) point tiling (>= 2 grid steps when B == 1 for v7x) ----------
        n_chunks = -(-N // CHUNK)
        tile_chunks = min(MAX_CHUNKS_PER_TILE, n_chunks)
        if B == 1 and n_chunks > 1:
            tile_chunks = min(tile_chunks, -(-n_chunks // 2))
        tb = tile_chunks * CHUNK
        n_tiles = -(-N // tb)
        P_pad = n_tiles * tb

        pts_pad = jnp.pad(input_points.astype(jnp.float32),
                          ((0, 0), (0, P_pad - N), (0, 0)))
        pts_cf = jnp.transpose(pts_pad, (0, 2, 1))           # [B, 2, P_pad]
        pts_h = jnp.concatenate(
            [pts_cf, jnp.ones((B, 1, P_pad), jnp.float32),
             jnp.zeros((B, 5, P_pad), jnp.float32)], axis=1)  # [B, 8, P_pad]

        # ---- 6) fused search + interp + distortion (Pallas) ----------------
        out = run_tutte_fused(pts_h, coef_j, table, tb)

        pred_points = jnp.transpose(out[:, 0:2, :N], (0, 2, 1))      # [B, N, 2]
        distortion = jnp.transpose(out[:, 2:6, :N], (0, 2, 1)).reshape(B * N, 2, 2)
        hit = out[:, 6, :N] > 0.5
        face_ids = jnp.where(hit, jnp.round(out[:, 7, :N]).astype(jnp.int32),
                             jnp.int32(-1)).reshape(B * N)

        return pred_points, {"new_vertices": new_vertices,
                             "distortion": distortion,
                             "face_ids": face_ids}

    return forward


# ----------------------------- main ------------------------------------------
if __name__ == "__main__":
    mesh = build_mesh(G=5)          # 25 verts, 32 faces, 112 directed edges, 16 bound
    E = mesh["edges"].shape[1]
    nb = mesh["bound_verts"].shape[0]

    B, N = 2, 64
    key = jax.random.PRNGKey(0)
    k1, k2 = jax.random.split(key)
    input_points = jax.random.uniform(k1, (B, N, 2), minval=-0.8, maxval=0.8,
                                      dtype=jnp.float32)
    var_pred = jax.random.normal(k2, (B, E + nb), dtype=jnp.float32)

    forward = make_forward(mesh)
    pred_points, ret = forward(input_points, var_pred)
    jax.block_until_ready((pred_points, ret))

    # ------------------ numpy f64 reference (same new_vertices) -------------
    verts = mesh["vertices"].astype(np.float64)
    faces = mesh["faces"]
    Av, Bv, Cv = verts[faces[:, 0]], verts[faces[:, 1]], verts[faces[:, 2]]
    d = (Av[:, 0] - Cv[:, 0]) * (Bv[:, 1] - Cv[:, 1]) \
        - (Bv[:, 0] - Cv[:, 0]) * (Av[:, 1] - Cv[:, 1])
    pts = np.asarray(input_points, np.float64).reshape(-1, 2)
    px, py = pts[:, :1], pts[:, 1:2]
    l1 = ((Bv[:, 1] - Cv[:, 1]) * (px - Cv[:, 0])
          + (Cv[:, 0] - Bv[:, 0]) * (py - Cv[:, 1])) / d
    l2 = ((Cv[:, 1] - Av[:, 1]) * (px - Cv[:, 0])
          + (Av[:, 0] - Cv[:, 0]) * (py - Cv[:, 1])) / d
    l3 = 1.0 - l1 - l2
    score = np.minimum(np.minimum(l1, l2), l3)                 # [B*N, F]
    ref_fid = np.argmax(score, axis=1)
    ridx = np.arange(pts.shape[0])
    w1, w2, w3 = l1[ridx, ref_fid], l2[ridx, ref_fid], l3[ridx, ref_fid]
    newv = np.asarray(ret["new_vertices"], np.float64)
    bidx = ridx // N
    tri = faces[ref_fid]
    nA = newv[bidx, tri[:, 0]]
    nB = newv[bidx, tri[:, 1]]
    nC = newv[bidx, tri[:, 2]]
    ref_pred = (w1[:, None] * nA + w2[:, None] * nB
                + w3[:, None] * nC).reshape(B, N, 2)

    e1 = Bv - Av
    e2 = Cv - Av
    invdet = 1.0 / (e1[:, 0] * e2[:, 1] - e2[:, 0] * e1[:, 1])
    newT = newv[:, faces, :]
    f1 = newT[:, :, 1, :] - newT[:, :, 0, :]
    f2 = newT[:, :, 2, :] - newT[:, :, 0, :]
    Mref = np.empty((B, faces.shape[0], 2, 2))
    Mref[..., 0, 0] = f1[..., 0] * (e2[:, 1] * invdet) + f2[..., 0] * (-e1[:, 1] * invdet)
    Mref[..., 0, 1] = f1[..., 0] * (-e2[:, 0] * invdet) + f2[..., 0] * (e1[:, 0] * invdet)
    Mref[..., 1, 0] = f1[..., 1] * (e2[:, 1] * invdet) + f2[..., 1] * (-e1[:, 1] * invdet)
    Mref[..., 1, 1] = f1[..., 1] * (-e2[:, 0] * invdet) + f2[..., 1] * (e1[:, 0] * invdet)
    ref_dist = Mref[bidx, ref_fid]

    face_ids = np.asarray(ret["face_ids"])
    pred_np = np.asarray(pred_points)
    dist_np = np.asarray(ret["distortion"])
    clear = score[ridx, ref_fid] > 0.1          # clearly-interior points only

    assert np.all(face_ids >= 0), "some points fell outside the mesh"
    assert np.all(np.isfinite(pred_np)) and np.all(np.isfinite(dist_np))
    assert np.all(np.isfinite(np.asarray(ret["new_vertices"])))
    assert np.all(np.abs(pred_np) <= 1.0 + 0.05)
    assert np.array_equal(face_ids[clear], ref_fid[clear]), "face assignment mismatch"
    assert np.allclose(pred_np, ref_pred, atol=5e-2), "pred_points mismatch"
    assert np.allclose(dist_np[clear], ref_dist[clear], atol=5e-2), "distortion mismatch"
    print("KERNEL_OK")
</pallas_src>

<mosaic_0001>
module attributes {stable_mosaic.version = 11 : i64} {
  func.func @tutte_fused_kernel(%arg0: i32, %arg1: i32, %arg2: memref<1x8x128xf32, #tpu.memory_space<vmem>>, %arg3: memref<96x8xf32, #tpu.memory_space<vmem>>, %arg4: memref<1x8x128xf32, #tpu.memory_space<vmem>>, %arg5: memref<1x8x128xf32, #tpu.memory_space<vmem>>) attributes {dimension_semantics = [#tpu.dimension_semantics<parallel>, #tpu.dimension_semantics<parallel>], iteration_bounds = array<i64: 2, 1>, scalar_prefetch = 0 : i64, scratch_operands = 0 : i64, tpu.core_type = #tpu.core_type<tc>, window_params = [{transform_indices = @transform_0, window_bounds = array<i64: 1, 8, 128>}, {pipeline_mode = #tpu.pipeline_mode<synchronous>, transform_indices = @transform_1, window_bounds = array<i64: 96, 8>}, {transform_indices = @transform_2, window_bounds = array<i64: 1, 8, 128>}, {transform_indices = @transform_3, window_bounds = array<i64: 1, 8, 128>}]} {
    %c0 = arith.constant 0 : index
    %c0_0 = arith.constant 0 : index
    %0 = vector.load %arg3[%c0, %c0_0] : memref<96x8xf32, #tpu.memory_space<vmem>>, vector<96x8xf32>
    %c0_1 = arith.constant 0 : index
    %c0_2 = arith.constant 0 : index
    %c0_3 = arith.constant 0 : index
    %1 = vector.load %arg4[%c0_1, %c0_2, %c0_3] : memref<1x8x128xf32, #tpu.memory_space<vmem>>, vector<1x8x128xf32>
    %2 = vector.shape_cast %1 : vector<1x8x128xf32> to vector<8x128xf32>
    %3 = tpu.iota {dimensions = array<i32: 0>} : vector<32x128xi32>
    %c32_i32 = arith.constant 32 : i32
    %c0_i32 = arith.constant 0 : i32
    %c128_i32 = arith.constant 128 : i32
    %4 = arith.muli %c0_i32, %c128_i32 : i32
    %5 = tpu.assume_multiple %4, 128 : i32
    %c0_4 = arith.constant 0 : index
    %c0_5 = arith.constant 0 : index
    %6 = arith.index_cast %5 : i32 to index
    %7 = vector.load %arg2[%c0_4, %c0_5, %6] : memref<1x8x128xf32, #tpu.memory_space<vmem>>, vector<1x8x128xf32>
    %8 = vector.shape_cast %7 : vector<1x8x128xf32> to vector<8x128xf32>
    %cst = arith.constant dense<0.000000e+00> : vector<96x128xf32>
    %9 = tpu.matmul %0, %8, %cst {dimension_numbers = #tpu.dot_dimension_numbers<[1], [0], [0], [1], [0, 0, 1, 1], [], []>} : vector<96x8xf32>, vector<8x128xf32>, vector<96x128xf32> -> vector<96x128xf32>
    %10 = vector.extract_strided_slice %9 {offsets = [0, 0], sizes = [32, 128], strides = [1, 1]} : vector<96x128xf32> to vector<32x128xf32>
    %11 = vector.extract_strided_slice %9 {offsets = [32, 0], sizes = [32, 128], strides = [1, 1]} : vector<96x128xf32> to vector<32x128xf32>
    %12 = vector.extract_strided_slice %9 {offsets = [64, 0], sizes = [32, 128], strides = [1, 1]} : vector<96x128xf32> to vector<32x128xf32>
    %13 = arith.minimumf %10, %11 : vector<32x128xf32>
    %14 = arith.minimumf %13, %12 : vector<32x128xf32>
    %cst_6 = arith.constant dense<0xFF800000> : vector<128xf32>
    %15 = vector.multi_reduction <maximumf>, %14, %cst_6 [0] : vector<32x128xf32> to vector<128xf32>
    %16 = vector.shape_cast %15 : vector<128xf32> to vector<1x128xf32>
    %17 = vector.broadcast %16 : vector<1x128xf32> to vector<32x128xf32>
    %18 = arith.cmpf oeq, %14, %17 : vector<32x128xf32>
    %19 = vector.broadcast %c32_i32 : i32 to vector<32x128xi32>
    %20 = arith.select %18, %3, %19 : vector<32x128xi1>, vector<32x128xi32>
    %cst_7 = arith.constant dense<2147483647> : vector<128xi32>
    %21 = vector.multi_reduction <minsi>, %20, %cst_7 [0] : vector<32x128xi32> to vector<128xi32>
    %22 = vector.shape_cast %21 : vector<128xi32> to vector<1x128xi32>
    %cst_8 = arith.constant -1.000000e-03 : f32
    %23 = vector.broadcast %cst_8 : f32 to vector<1x128xf32>
    %24 = arith.cmpf oge, %16, %23 : vector<1x128xf32>
    %25 = vector.broadcast %22 : vector<1x128xi32> to vector<32x128xi32>
    %26 = arith.cmpi eq, %3, %25 : vector<32x128xi32>
    %27 = vector.broadcast %24 : vector<1x128xi1> to vector<32x128xi1>
    %28 = arith.andi %26, %27 : vector<32x128xi1>
    %29 = arith.extui %28 : vector<32x128xi1> to vector<32x128xi32>
    %30 = arith.sitofp %29 : vector<32x128xi32> to vector<32x128xf32>
    %31 = arith.mulf %30, %10 : vector<32x128xf32>
    %32 = arith.mulf %30, %11 : vector<32x128xf32>
    %33 = arith.mulf %30, %12 : vector<32x128xf32>
    %34 = tpu.concatenate %30, %31, %32, %33 in 0 : vector<32x128xf32>, vector<32x128xf32>, vector<32x128xf32>, vector<32x128xf32> -> vector<128x128xf32>
    %cst_9 = arith.constant dense<0.000000e+00> : vector<8x128xf32>
    %35 = tpu.matmul %2, %34, %cst_9 {dimension_numbers = #tpu.dot_dimension_numbers<[1], [0], [0], [1], [0, 0, 1, 1], [], []>} : vector<8x128xf32>, vector<128x128xf32>, vector<8x128xf32> -> vector<8x128xf32>
    %c0_10 = arith.constant 0 : index
    %c0_11 = arith.constant 0 : index
    %36 = arith.index_cast %5 : i32 to index
    %37 = vector.load %arg5[%c0_10, %c0_11, %36] : memref<1x8x128xf32, #tpu.memory_space<vmem>>, vector<1x8x128xf32>
    %38 = vector.shape_cast %37 : vector<1x8x128xf32> to vector<8x128xf32>
    %39 = vector.shape_cast %35 : vector<8x128xf32> to vector<1x8x128xf32>
    tpu.vector_store %arg5[%c0_10, %c0_11, %36], %39 {strides = array<i32>} : memref<1x8x128xf32, #tpu.memory_space<vmem>>, vector<1x8x128xf32>,
    %c1_i32 = arith.constant 1 : i32
    return
  }
  func.func @transform_0(%arg0: i32, %arg1: i32) -> (i32, i32, i32) {
    %c0_i32 = arith.constant 0 : i32
    %c0_i32_0 = arith.constant 0 : i32
    return %arg0, %c0_i32, %arg1 : i32, i32, i32
  }
  func.func @transform_1(%arg0: i32, %arg1: i32) -> (i32, i32) {
    %c0_i32 = arith.constant 0 : i32
    %c0_i32_0 = arith.constant 0 : i32
    %c0_i32_1 = arith.constant 0 : i32
    return %c0_i32, %c0_i32_0 : i32, i32
  }
  func.func @transform_2(%arg0: i32, %arg1: i32) -> (i32, i32, i32) {
    %c0_i32 = arith.constant 0 : i32
    %c0_i32_0 = arith.constant 0 : i32
    %c0_i32_1 = arith.constant 0 : i32
    return %arg0, %c0_i32, %c0_i32_0 : i32, i32, i32
  }
  func.func @transform_3(%arg0: i32, %arg1: i32) -> (i32, i32, i32) {
    %c0_i32 = arith.constant 0 : i32
    %c0_i32_0 = arith.constant 0 : i32
    return %arg0, %c0_i32, %arg1 : i32, i32, i32
  }
}

</mosaic_0001>

<bundles_post_ra>
// kernel: neg.16
= control target key start
LH: loop header
LB: loop body
LE: loop exit
PB: predicated region body
PF: predicated region fallthrough
CT: control target
= control target key end

     0   :  { %s56_s0 = inlined_call_operand.vmem [shape: f32[22,2], index: 0, kind: input, shape index: {}]   ;;  %s57_s1 = inlined_call_operand.vmem [shape: f32[22,2], index: 1, kind: output, shape index: {}]  }
   0x1   :  { %v2_v0 = vld [vmem:[%s56_s0] sm:$0xff]  ;;  %v24_v1 = vld [vmem:[%s56_s0 + $0x8] sm:$0xff]  ;;  %v26_v2 = vld [vmem:[%s56_s0 + $0x10] sm:$0xff] }
   0x2   :  { %v5_v3 = vxor.u32 2147483648, %v2_v0  ;;  %v12_v4 = vxor.u32 2147483648, %v24_v1  ;;  %v20_v5 = vxor.u32 2147483648, %v26_v2 }
   0x4   :  { %7 = vst [vmem:[%s57_s1] sm:$0xff] %v5_v3  ;;  %25 = vst [vmem:[%s57_s1 + $0x8] sm:$0xff] %v12_v4 }
   0x5   :  { %27 = vst [vmem:[%s57_s1 + $0x10] sm:$0xff] %v20_v5 }

// kernel: neg.15
= control target key start
LH: loop header
LB: loop body
LE: loop exit
PB: predicated region body
PF: predicated region fallthrough
CT: control target
= control target key end

     0   :  { %s72_s0 = inlined_call_operand.vmem [shape: f32[32,2], index: 0, kind: input, shape index: {}]   ;;  %s73_s1 = inlined_call_operand.vmem [shape: f32[32,2], index: 1, kind: output, shape index: {}]  }
   0x1   :  { %v2_v0 = vld [vmem:[%s72_s0] sm:$0xff]  ;;  %v32_v1 = vld [vmem:[%s72_s0 + $0x8] sm:$0xff]  ;;  %v34_v2 = vld [vmem:[%s72_s0 + $0x10] sm:$0xff] }
   0x2   :  { %v5_v3 = vxor.u32 2147483648, %v2_v0  ;;  %v12_v4 = vxor.u32 2147483648, %v32_v1  ;;  %v20_v5 = vxor.u32 2147483648, %v34_v2  ;;  %v36_v6 = vld [vmem:[%s72_s0 + $0x18] sm:$0xff] }
   0x3   :  { %v28_v7 = vxor.u32 2147483648, %v36_v6 }
   0x4   :  { %7 = vst [vmem:[%s73_s1] sm:$0xff] %v5_v3  ;;  %33 = vst [vmem:[%s73_s1 + $0x8] sm:$0xff] %v12_v4 }
   0x5   :  { %35 = vst [vmem:[%s73_s1 + $0x10] sm:$0xff] %v20_v5  ;;  %37 = vst [vmem:[%s73_s1 + $0x18] sm:$0xff] %v28_v7 }

// kernel: custom-call.8
= control target key start
LH: loop header
LB: loop body
LE: loop exit
PB: predicated region body
PF: predicated region fallthrough
CT: control target
= control target key end

     0   :  { %5 = vsyncpa [#allocation4], 0  ;;  %s964_s0 = inlined_call_operand.vmem [shape: f32[2,9,9], index: 0, kind: input, shape index: {}]   ;;  %s965_s1 = inlined_call_operand.vmem [shape: f32[2,9,9], index: 1, kind: output, shape index: {0}]   ;;  %s966_s2 = inlined_call_operand.hbm [shape: s32[2,9], index: 2, kind: output, shape index: {1}]   ;;  %s967_s3 = inlined_call_operand.vmem [shape: s32[2,9], index: 3, kind: output, shape index: {2}]  }
   0x1   :  { %7 = vsyncpa [#allocation4 + $0x1], 0  ;;  %s755_s12 = smov 0   ;;  %s757_s13 = smov 0  }
   0x2   :  { %s759_s14 = smov 0   ;;  %s761_s15 = smov 0  }
   0x3 LB: > { %s776_s16 = sadd.s32 4294967295, %s723_s15   ;;  %s565_s17 = sadd.s32 4294967294, %s723_s15   ;;  %s723_s15 = sphi %s761_s15, %s975_s15   ;;  %s719_s14 = sphi %s759_s14, %s974_s14   ;;  %s715_s13 = sphi %s757_s13, %s973_s13   ;;  %s711_s12 = sphi %s755_s12, %s972_s12  }
   0x4   : > { %s780_s18 = sadd.s32 1, %s723_s15   ;;  %s17_s19 = sshrl.u32 %s723_s15, 3 }
   0x5   : > { %s18_s20 = sshrl.u32 %s780_s18, 3  ;;  %s22_s21 = sadd.s32 1, %s719_s14 }
   0x6   : > { %s19_s22 = ssub.s32 %s17_s19, %s18_s20  ;;  %p32_p0 = scmp.ne.s32.totalorder %s719_s14, %s715_s13 }
   0x7   : > { %p20_p1 = scmp.eq.s32.totalorder %s19_s22, 0  ;;  %p33_p2 = scmp.eq.s32.totalorder %s776_s16, 1 }
   0x8   : > { %p38_p3 = scmp.ne.s32.totalorder %s715_s13, %s711_s12  ;;  %p39_p4 = scmp.eq.s32.totalorder %s565_s17, 1 }
   0x9   : > { %s791_s23 = scalar_select %p20_p1, %s719_s14, %s22_s21  }
   0xa   : > { %p793_p5 = por %p33_p2, %p32_p0  ;;  %p797_p6 = por %p39_p4, %p38_p3 }
   0xb   : > { %p567_p7 = scmp.ge.s32.totalorder %s723_s15, 2 }
   0xc   : > { %s85_s26 = sand.u32 (!%p567_p7), 1, %s723_s15   ;;  %s569_s27 = sshll.u32 (!%p567_p7), %s723_s15, 4 }
   0xd   : > { %83 = sbr.rel (%p567_p7) target bundleno = 20 (0x14), region = 16  ;;  %s568_s28 = sshll.u32 (!%p567_p7), %s85_s26, 4 }
   0xe   : > { %s89_s4 = scalar_lea.vmem (!%p567_p7), %s964_s0, %s569_s27  ;;  %s87_s5 = scalar_lea.vmem (!%p567_p7), [#allocation0], %s568_s28 }
   0xf   : > { %v102_v0 = vld [vmem:[%s89_s4] sm:$0xff] (!%p567_p7)  ;;  %v104_v1 = vld [vmem:[%s89_s4 + $0x8] sm:$0xff] (!%p567_p7) }
  0x10   : > { %103 = vst [vmem:[%s87_s5] sm:$0xff] (!%p567_p7), %v102_v0  ;;  %105 = vst [vmem:[%s87_s5 + $0x8] sm:$0xff] (!%p567_p7), %v104_v1 }
  0x14 PF: > { %p570_p8 = scmp.ge.s32.totalorder %s723_s15, 1  ;;  %p110_p9 = scmp.lt.s32.totalorder %s723_s15, 3 }
  0x16   : > { %p111_p10 = pnand %p570_p8, %p110_p9 }
  0x18   : > { %114 = sbr.rel (%p111_p10) target bundleno = 450 (0x1c2), region = 39 }
  0x1f   : > { %s117_s6 = sand.u32 1, %s776_s16   ;;  %s132_s7 = sand.u32 1, %s715_s13   ;;  %v154_v2 = vlaneseq  ;;  %v733_v6 = vmov 0  }
  0x20   : > { %s571_s8 = sshll.u32 %s117_s6, 4  ;;  %s815_s9 = sshll.u32 %s132_s7, 1 }
  0x21   : > { %v818_v3 = vshrl.u32 %v154_v2, 7  ;;  %s119_s10 = scalar_lea.vmem [#allocation0], %s571_s8  ;;  %s820_s11 = scalar_lea.vmem [#allocation1], %s571_s8 }
  0x22   : > { %v143_v4 = vld [vmem:[%s119_s10] sm:$0xff]  ;;  %v575_v5 = vld [vmem:[%s119_s10 + $0x8] sm:$0xff]  ;;  %s149_s17 = sand.u32 7, %s776_s16   ;;  %s134_s20 = scalar_lea.vmem [#allocation3], %s815_s9 }
  0x23   : > { %144 = vst [vmem:[%s820_s11] sm:$0xff] %v143_v4  ;;  %576 = vst [vmem:[%s820_s11 + $0x8] sm:$0xff] %v575_v5  ;;  %s825_s19 = scalar_lea.vmem [#allocation2], %s149_s17  ;;  %s140_s21 = scalar_lea.vmem [#allocation6], %s815_s9 }
  0x24   : > { %153 = vst [vmem:[%s825_s19] sm:$0x1] %v733_v6  ;;  %s830_s22 = scalar_lea.vmem [#allocation5], %s149_s17  ;;  %s725_s26 = smov 0  }
  0x25 LB: >> { %s577_s27 = sshll.u32 %s727_s26, 3  ;;  %s162_s26 = sadd.s32 1, %s727_s26   ;;  %s727_s26 = sphi %s725_s26, %s162_s26  }
  0x26   : >> { %v166_v7 = vstv %s577_s27  ;;  %s164_s28 = scalar_lea.vmem [#allocation7], %s577_s27  ;;  %p159_p11 = scmp.ge.s32.totalorder %s162_s26, 2  }
  0x27   : >> { %v167_v8 = vadd.s32 %v166_v7, %v818_v3  ;;  %s833_s29 = smov (%p159_p11), 0  }
  0x28   : > { %161 = sbr.rel (!%p159_p11) target bundleno = 37 (0x25), region = 191 }
  0x29   : >> { %168 = vst [vmem:[%s164_s28] sm:$0xff] %v167_v8 }
  0x2f LB: >> { %v179_v9 = vld [vmem:[%s820_s11] sm:$0xff]  ;;  %v580_v10 = vld [vmem:[%s820_s11 + $0x8] sm:$0xff]  ;;  %v841_v11 = vadd.s32 8, %v818_v3  ;;  %v844_v13 = vstv %s731_s29  ;;  %s237_s30 = ssub.s32 128, %s731_s29  ;;  %v243_v46 = vand.u32 127, %v154_v2  ;;  %s249_s4 = scalar_lea.vmem %s820_s11, %s731_s29 [#allocation1]  ;;  %s731_s29 = sphi %s833_s29, %s174_s29  }
  0x30   : >> { %v180_v12 = vand.u32 2147483647, %v179_v9  ;;  %v192_v14 = vand.u32 2147483647, %v580_v10  ;;  %vm183_vm1 = vcmp.ge.s32.totalorder %v818_v3, %v844_v13  ;;  %v246_v49 = vld [vmem:[%s825_s19] ss:$0 sm:$0xff] }
  0x31   : >> { %vm196_vm0 = vcmp.lt.s32.totalorder %v841_v11, 9  ;;  %vm195_vm3 = vcmp.ge.s32.totalorder %v841_v11, %v844_v13  ;;  %vm267_vm15 = vcmp.gt.s32.totalorder %v243_v46, %v844_v13  ;;  %v251_v50 = vld [vmem:[%s249_s4] ss:$0 sm:$0xff]  ;;  %s255_s6 = scalar_lea.vmem [#allocation7], %s731_s29  ;;  %s174_s29 = sadd.s32 1, %s731_s29  }
  0x32   : >> { %vm579_vm2 = vcmp.gt.f32.partialorder %v180_v12, -inf  ;;  %vm197_vm5 = vmand %vm195_vm3, %vm196_vm0  ;;  %vm290_vm0 = vcmp.gt.s32.totalorder %v841_v11, %v844_v13  ;;  %v257_v51 = vld [vmem:[%s255_s6] ss:$0 sm:$0xff]  ;;  %p171_p12 = scmp.ge.s32.totalorder %s174_s29, 9  }
  0x33   : >> { %vm187_vm4 = vmand %vm183_vm1, %vm579_vm2  ;;  %vm244_vm1 = vcmp.eq.s32.totalorder %v243_v46, %v844_v13  ;;  %s400_s17 = sshrl.u32 (%p171_p12), %s776_s16, 3  ;;  %s586_s26 = sshll.u32 (%p171_p12), %s776_s16, 4 }
  0x34   : >> { %v188_v15 = vsel %vm187_vm4, %v818_v3, %v844_v13  ;;  %v189_v16 = vsel %vm187_vm4, %v180_v12, -inf  ;;  %vm865_vm2 = vmand %vm290_vm0, %vm244_vm1  ;;  %vm275_vm4 = vcmp.gt.s32.totalorder %v818_v3, %v844_v13  ;;  %s587_s27 = sshll.u32 (%p171_p12), %s400_s17, 5  ;;  %s377_s29 = scalar_lea.vmem (%p171_p12), %s965_s1, %s586_s26 }
  0x35   : >> { %vm198_vm6 = vcmp.lt.f32.partialorder %v189_v16, %v192_v14  ;;  %s734_s26 = smov (%p171_p12), [#allocation3]  }
  0x36   : >> { %vm199_vm7 = vmand %vm197_vm5, %vm198_vm6 }
  0x37   : >> { %v200_v17 = vsel %vm199_vm7, %v841_v11, %v188_v15  ;;  %v201_v18 = vsel %vm199_vm7, %v192_v14, %v189_v16  ;;  %vm279_vm6 = vmand %vm275_vm4, %vm244_vm1 }
  0x38   : >> { %v202_v19 = vrot.slane %v201_v18, 1  ;;  %v203_v20 = vrot.slane %v200_v17, 1 }
  0x3a   : >> { %vm204_vm8 = vcmp.ge.f32.partialorder %v202_v19, %v201_v18  ;;  %v207_v21 = vrot.slane %v202_v19, 1  ;;  %v208_v22 = vrot.slane %v203_v20, 1 }
  0x3b   : >> { %v205_v23 = vsel %vm204_vm8, %v202_v19, %v201_v18  ;;  %v206_v24 = vsel %vm204_vm8, %v203_v20, %v200_v17 }
  0x3c   : >> { %vm209_vm9 = vcmp.ge.f32.partialorder %v207_v21, %v205_v23  ;;  %v212_v25 = vrot.slane %v207_v21, 1  ;;  %v213_v26 = vrot.slane %v208_v22, 1 }
  0x3d   : >> { %v210_v27 = vsel %vm209_vm9, %v207_v21, %v205_v23  ;;  %v211_v28 = vsel %vm209_vm9, %v208_v22, %v206_v24 }
  0x3e   : >> { %vm214_vm10 = vcmp.ge.f32.partialorder %v212_v25, %v210_v27  ;;  %v217_v29 = vrot.slane %v212_v25, 1  ;;  %v218_v30 = vrot.slane %v213_v26, 1 }
  0x3f   : >> { %v215_v31 = vsel %vm214_vm10, %v212_v25, %v210_v27  ;;  %v216_v32 = vsel %vm214_vm10, %v213_v26, %v211_v28 }
  0x40   : >> { %vm219_vm11 = vcmp.ge.f32.partialorder %v217_v29, %v215_v31  ;;  %v222_v33 = vrot.slane %v217_v29, 1  ;;  %v223_v34 = vrot.slane %v218_v30, 1 }
  0x41   : >> { %v220_v35 = vsel %vm219_vm11, %v217_v29, %v215_v31  ;;  %v221_v36 = vsel %vm219_vm11, %v218_v30, %v216_v32 }
  0x42   : >> { %vm224_vm12 = vcmp.ge.f32.partialorder %v222_v33, %v220_v35  ;;  %v227_v37 = vrot.slane %v222_v33, 1  ;;  %v228_v38 = vrot.slane %v223_v34, 1 }
  0x43   : >> { %v225_v39 = vsel %vm224_vm12, %v222_v33, %v220_v35  ;;  %v226_v40 = vsel %vm224_vm12, %v223_v34, %v221_v36 }
  0x44   : >> { %vm229_vm13 = vcmp.ge.f32.partialorder %v227_v37, %v225_v39  ;;  %v232_v41 = vrot.slane %v227_v37, 1  ;;  %v233_v42 = vrot.slane %v228_v38, 1 }
  0x45   : >> { %v230_v43 = vsel %vm229_vm13, %v227_v37, %v225_v39  ;;  %v231_v44 = vsel %vm229_vm13, %v228_v38, %v226_v40 }
  0x46   : >> { %vm234_vm14 = vcmp.ge.f32.partialorder %v232_v41, %v230_v43 }
  0x47   : >> { %v236_v45 = vsel %vm234_vm14, %v233_v42, %v231_v44 }
  0x48   : >> { %238 = vrot.lane.b32.xlu0 %v236_v45, %s237_s30 }
  0xba   : >> { %v239_v48 = vpop.permute.xlu0 %238 }
  0xbb   : >> { %591 = vpush %v239_v48 }
  0xec   : >> { %s592_s5 = spop %591 }
  0xed   : >> { %v245_v52 = vstv %s592_s5  ;;  %s250_s8 = scalar_lea.vmem %s820_s11, %s592_s5 [#allocation1]  ;;  %s256_s10 = scalar_lea.vmem [#allocation7], %s592_s5 }
  0xee   : >> { %v247_v53 = vsel %vm244_vm1, %v245_v52, %v246_v49  ;;  %v252_v54 = vld [vmem:[%s250_s8] ss:$0 sm:$0xff]  ;;  %s911_s5 = scalar_lea.hbm (%p171_p12), %s966_s2, %s587_s27 }
  0xef   : >> { %v258_v55 = vld [vmem:[%s256_s10] ss:$0 sm:$0xff]  ;;  %248 = vst [vmem:[%s825_s19] sm:$0x1] %v247_v53  ;;  %253 = vst [vmem:[%s250_s8] sm:$0x1] %v251_v50  ;;  %vm261_vm3 = vcmp.ne.f32.partialorder %v252_v54, 0.0  ;;  %v268_v5 = vsel %vm267_vm15, %v252_v54, 0.0 }
  0xf0   : >> { %259 = vst [vmem:[%s256_s10] sm:$0x1] %v257_v51  ;;  %254 = vst [vmem:[%s249_s4] sm:$0x1] %v252_v54  ;;  %s368_s8 = scalar_lea.sflag (%p171_p12), [#allocation4], %s132_s7  ;;  %s657_s19 = sshll.u32 (%p171_p12), %s734_s26, 4  ;;  %s658_s19 = int_to_ptr.vmem [resolvable:$false] %s657_s19 }
  0xf1   : >> { %260 = vst [vmem:[%s255_s6] sm:$0x1] %v258_v55  ;;  %vm262_vm5 = vmand %vm244_vm1, %vm261_vm3  ;;  %s407_s6 = sshll.u32 (%p171_p12), %s134_s20, 4  ;;  %s408_s6 = int_to_ptr.vmem [resolvable:$true] %s407_s6 }
  0xf2   : >> { %v263_v56 = vsel %vm262_vm5, %v252_v54, 1.0  ;;  %s653_s10 = scalar_lea.vmem (%p171_p12), %s408_s6, 32  ;;  %p660_p2 = scmp.lt.s32.totalorder (%p171_p12), %s408_s6, %s658_s19 }
  0xf3   : >> { %v291_v57 = vsel %vm290_vm0, %v263_v56, 1.0  ;;  %v276_v58 = vsel %vm275_vm4, %v263_v56, 1.0  ;;  %p654_p13 = scmp.ne.s32.totalorder (%p171_p12), %s408_s6, %s653_s10 }
  0xf4   : >> { %649 = vrcp.f32 %v291_v57 }
  0xf5   : >> { %651 = vrcp.f32 %v276_v58  ;;  %p655_p0 = pnand (%p171_p12), %p654_p13, %p793_p5 }
  0xf6   : > { %v354_v14 = vld [vmem:[#allocation2] sm:$0x3] (%p171_p12) }
  0xf7   : >> { %v581_v60 = vld [vmem:[%s820_s11 + $0x8] sm:$0xff]  ;;  %v272_v63 = vld [vmem:[%s820_s11] sm:$0xff]  ;;  %356 = vst [vmem:[%s134_s20] sm:$0x3] (%p171_p12), %v354_v14  ;;  %p656_p1 = pneg (%p171_p12), %p655_p0 }
  0xf8   : > { %v301_v12 = vld [vmem:[#allocation7] sm:$0xff] (%p171_p12)  ;;  %v303_v13 = vld [vmem:[#allocation7 + $0x8] sm:$0xff] (%p171_p12) }
  0xfe   : >> { %v650_v59 = vpop.eup %649 }
  0xff   : >> { %v652_v61 = vpop.eup %651  ;;  %v293_v62 = vmul.f32 %v650_v59, %v581_v60 }
 0x100   : >> { %v278_v0 = vmul.f32 %v652_v61, %v272_v63 }
 0x101   : >> { %v295_v1 = vsel %vm865_vm2, %v293_v62, 0.0 }
 0x102   : >> { %296 = vadd.xlane.f32.xlu1 %v295_v1  ;;  %v280_v4 = vsel %vm279_vm6, %v278_v0, 0.0 }
 0x103   : >> { %281 = vadd.xlane.f32.xlu0 %v280_v4 }
 0x130   : > { %318 = vxpose.xlu0.b32.start [1/2] (short) (narrow) (%p171_p12), %v301_v12, 8 }
 0x134   : > { %319 = vxpose.xlu0.b32.end [2/2] (short) (narrow) (%p171_p12), %v303_v13, 8 }
 0x18f   : >> { %v297_v6 = vpop.xlane.xlu1 %296  ;;  %173 = sbr.rel (!%p171_p12) target bundleno = 47 (0x2f), region = 202 }
 0x190   : >> { %v298_v7 = vmul.f32 %v297_v6, %v268_v5  ;;  %v282_v8 = vpop.xlane.xlu0 %281 }
 0x191   : >> { %v283_v9 = vmul.f32 %v282_v8, %v268_v5 }
 0x192   : >> { %v299_v10 = vsub.f32 %v293_v62, %v298_v7 }
 0x193   : >> { %v284_v11 = vsub.f32 %v278_v0, %v283_v9 }
 0x194   : >> { %582 = vst [vmem:[%s820_s11 + $0x8] sm:$0xff] %v299_v10 }
 0x195   : >> { %285 = vst [vmem:[%s820_s11] sm:$0xff] %v284_v11 }
 0x19b   : > { %v392_v3 = vld [vmem:[%s820_s11 + $0x8] sm:$0xff] }
 0x19c   : > { %v390_v2 = vld [vmem:[%s820_s11] sm:$0xff]  ;;  %393 = vst [vmem:[%s377_s29 + $0x8] sm:$0xff] %v392_v3  ;;  %s659_s11 = scalar_lea.vmem %s658_s19, 64 }
 0x19d   : > { %391 = vst [vmem:[%s377_s29] sm:$0xff] %v390_v2  ;;  %p661_p3 = scmp.lt.s32.totalorder %s659_s11, %s653_s10 }
 0x19f   : > { %p662_p4 = por %p661_p3, %p660_p2 }
 0x1a1   : > { %p663_p8 = pnand %p662_p4, %p656_p1 }
 0x1a3   : > { %666 = shalt.err (!%p663_p8)
}
 0x1a4   : > { %s667_s7 = scalar_lea.hbm %s911_s5, 32  ;;  %s671_s28 = scalar_lea.hbm %s966_s2, 32 }
 0x1a5   : > { %p668_p9 = scmp.ne.s32.totalorder %s911_s5, %s667_s7  ;;  %p672_p12 = scmp.lt.u32.totalorder %s911_s5, %s966_s2 }
 0x1a6   : > { %p673_p13 = scmp.lt.u32.totalorder %s671_s28, %s667_s7  ;;  %p675_p1 = scmp.lt.u32.totalorder %s667_s7, %s911_s5 }
 0x1a7   : > { %p669_p10 = pnand %p668_p9, %p793_p5 }
 0x1a8   : > { %p674_p0 = por %p673_p13, %p672_p12 }
 0x1a9   : > { %p670_p11 = pneg %p669_p10 }
 0x1aa   : > { %p676_p2 = por %p675_p1, %p674_p0 }
 0x1ac   : > { %p677_p3 = pnand %p676_p2, %p670_p11 }
 0x1ae   : > { %680 = shalt.err (!%p677_p3)
}
 0x1af   : > { %593 = dma.vmem_to_hbm [thread:$0]  (%p793_p5), %s408_s6, 32, %s911_s5, %s368_s8  }
 0x1b0   : > { %v334_v15 = vpop.trf.xlu0  ;;  %s588_s4 = sshll.u32 (%p793_p5), %s400_s17, 1 }
 0x1b1   : > { %350 = vst [vmem:[%s830_s22] sm:$0x1] %v334_v15  ;;  %s416_s19 = scalar_lea.vmem (%p793_p5), %s967_s3, %s588_s4 }
 0x1b3   : > { %413 = sbr.rel (!%p793_p5) target bundleno = 450 (0x1c2), region = 80 }
 0x1b8   : > { %v360_v16 = vld [vmem:[#allocation5] sm:$0x3] }
 0x1b9   : > { %362 = vst [vmem:[%s140_s21] sm:$0x3] %v360_v16 }
 0x1c0   : > { %v432_v17 = vld [vmem:[%s140_s21] sm:$0x3] }
 0x1c1   : > { %433 = vst [vmem:[%s416_s19] sm:$0x3] %v432_v17 }
 0x1c2 PF: > { %s460_s22 = sand.u32 1, %s711_s12   ;;  %p596_p5 = pnand %p567_p7, %p797_p6 }
 0x1c3   : > { %s461_s24 = scalar_lea.sflag [#allocation4], %s460_s22 }
 0x1c4   : > { %706 = dma.done.wait (!%p596_p5), %s461_s24, 32  }
 0x1c5   : > { %708 = vsyncadd (!%p596_p5), %s461_s24, 4294967264  ;;  %p10_p4 = scmp.ge.s32.totalorder %s780_s18, 4   ;;  %s972_s12 = smov %s715_s13 }
 0x1c6   : > { %s973_s13 = smov %s719_s14  ;;  %s974_s14 = smov %s791_s23 }
 0x1c7   : > { %s975_s15 = smov %s780_s18  ;;  %12 = sbr.rel (!%p10_p4) target bundleno = 3 (0x3), region = 213 }
 0x1ce   :  { %473 = vsyncpa [#allocation4], 1 }
 0x1cf   :  { %475 = vsyncpa [#allocation4 + $0x1], 1 }

// kernel: custom-call.10
= control target key start
LH: loop header
LB: loop body
LE: loop exit
PB: predicated region body
PF: predicated region fallthrough
CT: control target
= control target key end

     0   :  { %s454_s6 = smov 0   ;;  %s456_s7 = smov 0   ;;  %s528_s0 = inlined_call_operand.vmem [shape: f32[2,1,9,9], index: 0, kind: input, shape index: {}]   ;;  %s529_s1 = inlined_call_operand.vmem [shape: f32[2,1,9,9], index: 1, kind: output, shape index: {}]  }
   0x1   :  { %s458_s8 = smov 0  }
   0x2 LB: > { %s370_s9 = sadd.s32 4294967295, %s440_s8   ;;  %s33_s10 = sadd.s32 1, %s436_s7  ;;  %s440_s8 = sphi %s458_s8, %s7_s8   ;;  %s436_s7 = sphi %s456_s7, %s531_s7   ;;  %s432_s6 = sphi %s454_s6, %s530_s6  }
   0x3   : > { %p35_p0 = scmp.ge.s32.totalorder %s33_s10, 2  ;;  %p372_p1 = scmp.ge.s32.totalorder %s440_s8, 2 }
   0x4   : > { %s49_s11 = sand.u32 (!%p372_p1), 1, %s440_s8   ;;  %s386_s12 = sshll.u32 (!%p372_p1), %s436_s7, 4 }
   0x5   : > { %s533_s10 = smov (%p35_p0, %s33_s10), 0  ;;  %47 = sbr.rel (%p372_p1) target bundleno = 12 (0xc), region = 16 }
   0x6   : > { %s373_s13 = sshll.u32 (!%p372_p1), %s49_s11, 4  ;;  %s58_s16 = scalar_lea.vmem (!%p372_p1), %s528_s0, %s386_s12 }
   0x7   : > { %v88_v0 = vld [vmem:[%s58_s16] sm:$0xff] (!%p372_p1)  ;;  %v90_v1 = vld [vmem:[%s58_s16 + $0x8] sm:$0xff] (!%p372_p1)  ;;  %s51_s17 = scalar_lea.vmem (!%p372_p1), [#allocation0], %s373_s13 }
   0x8   : > { %89 = vst [vmem:[%s51_s17] sm:$0xff] (!%p372_p1), %v88_v0  ;;  %91 = vst [vmem:[%s51_s17 + $0x8] sm:$0xff] (!%p372_p1), %v90_v1 }
   0xc PF: > { %p376_p2 = scmp.ge.s32.totalorder %s440_s8, 1  ;;  %p96_p3 = scmp.lt.s32.totalorder %s440_s8, 3 }
   0xe   : > { %p97_p4 = pnand %p376_p2, %p96_p3 }
  0x10   : > { %100 = sbr.rel (%p97_p4) target bundleno = 1358 (0x54e), region = 54 }
  0x17   : > { %s103_s18 = sand.u32 1, %s370_s9   ;;  %v114_v2 = vlaneseq  ;;  %v442_v11 = vmov -1.0   ;;  %v443_v55 = vmov 0.0   ;;  %s387_s21 = sshll.u32 %s432_s6, 4 }
  0x18   : > { %s377_s19 = sshll.u32 %s103_s18, 4  ;;  %s270_s24 = scalar_lea.vmem %s529_s1, %s387_s21 }
  0x19   : > { %v481_v3 = vand.u32 127, %v114_v2  ;;  %v118_v4 = vshrl.u32 %v114_v2, 7  ;;  %s483_s20 = scalar_lea.vmem [#allocation0], %s377_s19 }
  0x1a   : > { %v121_v5 = vld [vmem:[%s483_s20] sm:$0xff]  ;;  %v379_v38 = vld [vmem:[%s483_s20 + $0x8] sm:$0xff] }
  0x1b   : > { %vm120_vm0 = vcmp.eq.s32.totalorder %v118_v4, %v481_v3  ;;  %vm116_vm1 = vcmp.lt.s32.totalorder %v481_v3, 9  ;;  %vm125_vm2 = vcmp.ge.s32.totalorder %v118_v4, %v481_v3  ;;  %vm155_vm4 = vcmp.eq.s32.totalorder %v481_v3, 0 }
  0x1c   : > { %v122_v6 = vsel %vm120_vm0, %v121_v5, 0.0  ;;  %vm126_vm3 = vmand %vm125_vm2, %vm116_vm1  ;;  %vm152_vm5 = vcmp.eq.s32.totalorder %v481_v3, %v118_v4  ;;  %v156_v12 = vsel %vm155_vm4, 1.0, %v442_v11  ;;  %vm170_vm6 = vcmp.eq.s32.totalorder %v481_v3, 1 }
  0x1d   : > { %123 = vadd.xlane.f32.xlu0 %v122_v6  ;;  %v127_v8 = vsel %vm126_vm3, %v121_v5, 0.0  ;;  %v157_v13 = vsel %vm152_vm5, %v156_v12, 0.0  ;;  %vm180_vm7 = vcmp.eq.s32.totalorder %v481_v3, 2  ;;  %vm190_vm8 = vcmp.eq.s32.totalorder %v481_v3, 3 }
  0x1e   : > { %vm200_vm9 = vcmp.eq.s32.totalorder %v481_v3, 4  ;;  %v135_v33 = vadd.s32 8, %v118_v4  ;;  %vm210_vm11 = vcmp.eq.s32.totalorder %v481_v3, 5  ;;  %vm220_vm14 = vcmp.eq.s32.totalorder %v481_v3, 6 }
  0x1f   : > { %vm230_vm0 = vcmp.eq.s32.totalorder %v481_v3, 7 }
  0x20   : > { %vm136_vm10 = vcmp.eq.s32.totalorder %v135_v33, %v481_v3  ;;  %vm141_vm12 = vcmp.ge.s32.totalorder %v135_v33, %v481_v3  ;;  %vm163_vm15 = vcmp.eq.s32.totalorder %v481_v3, %v135_v33 }
  0x21   : > { %v138_v39 = vsel %vm136_vm10, %v379_v38, 0.0  ;;  %vm142_vm13 = vmand %vm141_vm12, %vm116_vm1  ;;  %v164_v56 = vsel %vm163_vm15, -1.0, %v443_v55  ;;  %vm240_vm1 = vcmp.eq.s32.totalorder %v481_v3, 8 }
  0x22   : > { %v143_v46 = vsel %vm142_vm13, %v379_v38, 0.0 }
  0xaa   : > { %v487_v7 = vpop.xlane.xlu0 %123 }
  0xab   : > { %414 = vrcp.f32 %v487_v7  ;;  %vm251_vm3 = vweird.f32 %v487_v7 }
  0xb5   : > { %v494_v9 = vpop.eup %414 }
  0xb6   : > { %v129_v10 = vmul.f32 %v494_v9, %v127_v8 }
  0xb8   : > { %130 = vst [vmem:[#allocation2] sm:$0xff] %v129_v10 }
  0xbf   : > { %v166_v14 = vld [vmem:[#allocation2 + $0x1] ss:$0 sm:$0xff]  ;;  %v176_v17 = vld [vmem:[#allocation2 + $0x2] ss:$0 sm:$0xff]  ;;  %v186_v22 = vld [vmem:[#allocation2 + $0x3] ss:$0 sm:$0xff] }
  0xc0   : > { %v167_v15 = vxor.u32 2147483648, %v166_v14  ;;  %v177_v19 = vxor.u32 2147483648, %v176_v17  ;;  %v187_v24 = vxor.u32 2147483648, %v186_v22  ;;  %v196_v27 = vld [vmem:[#allocation2 + $0x4] ss:$0 sm:$0xff] }
  0xc1   : > { %v197_v29 = vxor.u32 2147483648, %v196_v27  ;;  %v206_v32 = vld [vmem:[#allocation2 + $0x5] ss:$0 sm:$0xff]  ;;  %v216_v40 = vld [vmem:[#allocation2 + $0x6] ss:$0 sm:$0xff] }
  0xc2   : > { %v171_v16 = vmul.f32 %v167_v15, %v157_v13  ;;  %v207_v35 = vxor.u32 2147483648, %v206_v32  ;;  %v217_v42 = vxor.u32 2147483648, %v216_v40  ;;  %v226_v49 = vld [vmem:[#allocation2 + $0x7] ss:$0 sm:$0xff] }
  0xc3   : > { %v227_v52 = vxor.u32 2147483648, %v226_v49 }
  0xc4   : > { %172 = vadd.xlane.f32.xlu0 %v171_v16 }
 0x151   : > { %v173_v18 = vpop.xlane.xlu0 %172 }
 0x152   : > { %v174_v20 = vsel %vm170_vm6, %v173_v18, %v157_v13 }
 0x153   : > { %v181_v21 = vmul.f32 %v177_v19, %v174_v20 }
 0x155   : > { %182 = vadd.xlane.f32.xlu1 %v181_v21 }
 0x1e2   : > { %v183_v23 = vpop.xlane.xlu1 %182 }
 0x1e3   : > { %v184_v25 = vsel %vm180_vm7, %v183_v23, %v174_v20 }
 0x1e4   : > { %v191_v26 = vmul.f32 %v187_v24, %v184_v25 }
 0x1e6   : > { %192 = vadd.xlane.f32.xlu1 %v191_v26 }
 0x273   : > { %v193_v28 = vpop.xlane.xlu1 %192 }
 0x274   : > { %v194_v30 = vsel %vm190_vm8, %v193_v28, %v184_v25 }
 0x275   : > { %v201_v31 = vmul.f32 %v197_v29, %v194_v30 }
 0x277   : > { %202 = vadd.xlane.f32.xlu0 %v201_v31 }
 0x304   : > { %v203_v34 = vpop.xlane.xlu0 %202 }
 0x305   : > { %v204_v36 = vsel %vm200_vm9, %v203_v34, %v194_v30 }
 0x306   : > { %v211_v37 = vmul.f32 %v207_v35, %v204_v36 }
 0x308   : > { %212 = vadd.xlane.f32.xlu1 %v211_v37 }
 0x30c   : > { %139 = vadd.xlane.f32.xlu1 %v138_v39 }
 0x395   : > { %v213_v41 = vpop.xlane.xlu1 %212 }
 0x396   : > { %v214_v43 = vsel %vm210_vm11, %v213_v41, %v204_v36 }
 0x397   : > { %v221_v44 = vmul.f32 %v217_v42, %v214_v43 }
 0x399   : > { %222 = vadd.xlane.f32.xlu0 %v221_v44  ;;  %v140_v45 = vpop.xlane.xlu1 %139 }
 0x39a   : > { %416 = vrcp.f32 %v140_v45  ;;  %vm256_vm2 = vweird.f32 %v140_v45 }
 0x3a4   : > { %v417_v47 = vpop.eup %416 }
 0x3a5   : > { %v145_v48 = vmul.f32 %v417_v47, %v143_v46 }
 0x3a7   : > { %146 = vst [vmem:[#allocation2 + $0x8] sm:$0xff] %v145_v48 }
 0x3ae   : > { %v236_v50 = vld [vmem:[#allocation2 + $0x8] ss:$0 sm:$0xff] }
 0x3af   : > { %v237_v53 = vxor.u32 2147483648, %v236_v50 }
 0x3b1   : > { %v245_v58 = vmul.f32 %v237_v53, %v164_v56 }
 0x426   : > { %v223_v51 = vpop.xlane.xlu0 %222 }
 0x427   : > { %v224_v54 = vsel %vm220_vm14, %v223_v51, %v214_v43 }
 0x428   : > { %v231_v57 = vmul.f32 %v227_v52, %v224_v54 }
 0x42a   : > { %232 = vadd.xlane.f32.xlu0 %v231_v57 }
 0x42e   : > { %246 = vadd.xlane.f32.xlu0 %v245_v58 }
 0x4b7   : > { %v233_v59 = vpop.xlane.xlu0 %232 }
 0x4b8   : > { %v234_v60 = vsel %vm230_vm0, %v233_v59, %v224_v54 }
 0x4b9   : > { %v241_v61 = vmul.f32 %v237_v53, %v234_v60 }
 0x4bb   : > { %v247_v62 = vpop.xlane.xlu0 %246  ;;  %242 = vadd.xlane.f32.xlu1 %v241_v61 }
 0x4bc   : > { %v248_v63 = vsel %vm240_vm1, %v247_v62, %v164_v56 }
 0x4bd   : > { %v255_v0 = vmul.f32 %v417_v47, %v248_v63 }
 0x4bf   : > { %v257_v1 = vsel %vm256_vm2, %v248_v63, %v255_v0 }
 0x4c0   : > { %303 = vst [vmem:[%s270_s24 + $0x8] sm:$0xff] %v257_v1 }
 0x548   : > { %v243_v2 = vpop.xlane.xlu1 %242 }
 0x549   : > { %v244_v4 = vsel %vm240_vm1, %v243_v2, %v234_v60 }
 0x54a   : > { %v250_v5 = vmul.f32 %v494_v9, %v244_v4 }
 0x54c   : > { %v252_v3 = vsel %vm251_vm3, %v244_v4, %v250_v5 }
 0x54d   : > { %301 = vst [vmem:[%s270_s24] sm:$0xff] %v252_v3 }
 0x54e PF: > { %s7_s8 = sadd.s32 1, %s440_s8   ;;  %s530_s6 = smov %s436_s7 }
 0x54f   : > { %p4_p5 = scmp.ge.s32.totalorder %s7_s8, 4   ;;  %s531_s7 = smov %s533_s10 }
 0x551   :  { %6 = sbr.rel (!%p4_p5) target bundleno = 2 (0x2), region = 129 }

// kernel: custom-call.9
= control target key start
LH: loop header
LB: loop body
LE: loop exit
PB: predicated region body
PF: predicated region fallthrough
CT: control target
= control target key end

     0   :  { %s481_s6 = smov 0   ;;  %s483_s7 = smov 0   ;;  %s554_s0 = inlined_call_operand.vmem [shape: f32[2,1,9,9], index: 0, kind: input, shape index: {}]   ;;  %s555_s1 = inlined_call_operand.vmem [shape: f32[2,1,9,9], index: 1, kind: output, shape index: {}]  }
   0x1   :  { %s485_s8 = smov 0  }
   0x2 LB: > { %s397_s9 = sadd.s32 4294967295, %s467_s8   ;;  %s33_s10 = sadd.s32 1, %s463_s7  ;;  %s467_s8 = sphi %s485_s8, %s7_s8   ;;  %s463_s7 = sphi %s483_s7, %s557_s7   ;;  %s459_s6 = sphi %s481_s6, %s556_s6  }
   0x3   : > { %p35_p0 = scmp.ge.s32.totalorder %s33_s10, 2  ;;  %p399_p1 = scmp.ge.s32.totalorder %s467_s8, 2 }
   0x4   : > { %s49_s11 = sand.u32 (!%p399_p1), 1, %s467_s8   ;;  %s413_s12 = sshll.u32 (!%p399_p1), %s463_s7, 4 }
   0x5   : > { %s559_s10 = smov (%p35_p0, %s33_s10), 0  ;;  %47 = sbr.rel (%p399_p1) target bundleno = 12 (0xc), region = 16 }
   0x6   : > { %s400_s13 = sshll.u32 (!%p399_p1), %s49_s11, 4  ;;  %s58_s16 = scalar_lea.vmem (!%p399_p1), %s554_s0, %s413_s12 }
   0x7   : > { %v88_v0 = vld [vmem:[%s58_s16] sm:$0xff] (!%p399_p1)  ;;  %v90_v1 = vld [vmem:[%s58_s16 + $0x8] sm:$0xff] (!%p399_p1)  ;;  %s51_s17 = scalar_lea.vmem (!%p399_p1), [#allocation0], %s400_s13 }
   0x8   : > { %89 = vst [vmem:[%s51_s17] sm:$0xff] (!%p399_p1), %v88_v0  ;;  %91 = vst [vmem:[%s51_s17 + $0x8] sm:$0xff] (!%p399_p1), %v90_v1 }
   0xc PF: > { %p403_p2 = scmp.ge.s32.totalorder %s467_s8, 1  ;;  %p96_p3 = scmp.lt.s32.totalorder %s467_s8, 3 }
   0xe   : > { %p97_p4 = pnand %p403_p2, %p96_p3 }
  0x10   : > { %100 = sbr.rel (%p97_p4) target bundleno = 1358 (0x54e), region = 54 }
  0x17   : > { %s103_s18 = sand.u32 1, %s397_s9   ;;  %v114_v2 = vlaneseq  ;;  %v469_v12 = vmov -1.0   ;;  %v470_v16 = vmov 0.0   ;;  %s414_s21 = sshll.u32 %s459_s6, 4 }
  0x18   : > { %s404_s19 = sshll.u32 %s103_s18, 4  ;;  %s297_s24 = scalar_lea.vmem %s555_s1, %s414_s21 }
  0x19   : > { %v508_v3 = vand.u32 127, %v114_v2  ;;  %v118_v4 = vshrl.u32 %v114_v2, 7  ;;  %s510_s20 = scalar_lea.vmem [#allocation0], %s404_s19 }
  0x1a   : > { %v121_v5 = vld [vmem:[%s510_s20] sm:$0xff] }
  0x1b   : > { %vm116_vm0 = vcmp.lt.s32.totalorder %v508_v3, 9  ;;  %vm120_vm1 = vcmp.eq.s32.totalorder %v118_v4, %v508_v3  ;;  %vm125_vm2 = vcmp.le.s32.totalorder %v118_v4, %v508_v3  ;;  %v522_v11 = vadd.s32 8, %v118_v4 }
  0x1c   : > { %v122_v6 = vsel %vm120_vm1, %v121_v5, 0.0  ;;  %vm126_vm3 = vmand %vm125_vm2, %vm116_vm0  ;;  %vm162_vm4 = vcmp.eq.s32.totalorder %v508_v3, 8  ;;  %vm152_vm6 = vcmp.eq.s32.totalorder %v508_v3, %v118_v4  ;;  %vm170_vm7 = vcmp.eq.s32.totalorder %v508_v3, 7 }
  0x1d   : > { %v127_v7 = vsel %vm126_vm3, %v121_v5, 0.0  ;;  %123 = vadd.xlane.f32.xlu0 %v122_v6  ;;  %vm159_vm5 = vcmp.eq.s32.totalorder %v508_v3, %v522_v11  ;;  %v163_v13 = vsel %vm162_vm4, 1.0, %v469_v12  ;;  %v153_v17 = vsel %vm152_vm6, -1.0, %v470_v16  ;;  %v406_v6 = vld [vmem:[%s510_s20 + $0x8] sm:$0xff] }
  0x1e   : > { %v164_v14 = vsel %vm159_vm5, %v163_v13, 0.0  ;;  %vm184_vm8 = vcmp.eq.s32.totalorder %v508_v3, 6  ;;  %vm198_vm9 = vcmp.eq.s32.totalorder %v508_v3, 5  ;;  %vm212_vm10 = vcmp.eq.s32.totalorder %v508_v3, 4 }
  0x1f   : > { %vm226_vm11 = vcmp.eq.s32.totalorder %v508_v3, 3  ;;  %vm240_vm12 = vcmp.eq.s32.totalorder %v508_v3, 2  ;;  %vm136_vm13 = vcmp.eq.s32.totalorder %v522_v11, %v508_v3  ;;  %vm254_vm14 = vcmp.eq.s32.totalorder %v508_v3, 1 }
  0x20   : > { %vm267_vm15 = vcmp.eq.s32.totalorder %v508_v3, 0 }
  0xaa   : > { %v516_v8 = vpop.xlane.xlu0 %123 }
  0xab   : > { %441 = vrcp.f32 %v516_v8  ;;  %vm278_vm0 = vweird.f32 %v516_v8 }
  0xb5   : > { %v519_v9 = vpop.eup %441 }
  0xb6   : > { %v129_v10 = vmul.f32 %v519_v9, %v127_v7  ;;  %v138_v7 = vsel %vm136_vm13, %v406_v6, 0.0 }
  0xb8   : > { %130 = vst [vmem:[#allocation2] sm:$0xff] %v129_v10 }
  0xbf   : > { %v166_v15 = vld [vmem:[#allocation2 + $0x7] ss:$0 sm:$0xff]  ;;  %v180_v21 = vld [vmem:[#allocation2 + $0x6] ss:$0 sm:$0xff]  ;;  %v194_v29 = vld [vmem:[#allocation2 + $0x5] ss:$0 sm:$0xff] }
  0xc0   : > { %v167_v18 = vxor.u32 2147483648, %v166_v15  ;;  %v181_v24 = vxor.u32 2147483648, %v180_v21  ;;  %v195_v32 = vxor.u32 2147483648, %v194_v29  ;;  %v208_v37 = vld [vmem:[#allocation2 + $0x4] ss:$0 sm:$0xff] }
  0xc1   : > { %v209_v40 = vxor.u32 2147483648, %v208_v37  ;;  %v222_v45 = vld [vmem:[#allocation2 + $0x3] ss:$0 sm:$0xff]  ;;  %v236_v53 = vld [vmem:[#allocation2 + $0x2] ss:$0 sm:$0xff] }
  0xc2   : > { %v175_v19 = vmul.f32 %v167_v18, %v164_v14  ;;  %v171_v20 = vmul.f32 %v167_v18, %v153_v17  ;;  %v223_v48 = vxor.u32 2147483648, %v222_v45  ;;  %v237_v56 = vxor.u32 2147483648, %v236_v53  ;;  %v250_v61 = vld [vmem:[#allocation2 + $0x1] ss:$0 sm:$0xff]  ;;  %v263_v10 = vld [vmem:[#allocation2] ss:$0 sm:$0xff] }
  0xc3   : > { %v251_v0 = vxor.u32 2147483648, %v250_v61 }
  0xc4   : > { %176 = vadd.xlane.f32.xlu1 %v175_v19  ;;  %172 = vadd.xlane.f32.xlu0 %v171_v20 }
 0x151   : > { %v177_v22 = vpop.xlane.xlu1 %176  ;;  %v173_v23 = vpop.xlane.xlu0 %172 }
 0x152   : > { %v178_v25 = vsel %vm170_vm7, %v177_v22, %v164_v14  ;;  %v174_v26 = vsel %vm170_vm7, %v173_v23, %v153_v17  ;;  %v264_v14 = vxor.u32 2147483648, %v263_v10 }
 0x153   : > { %v189_v27 = vmul.f32 %v181_v24, %v178_v25  ;;  %v185_v28 = vmul.f32 %v181_v24, %v174_v26 }
 0x155   : > { %190 = vadd.xlane.f32.xlu0 %v189_v27  ;;  %186 = vadd.xlane.f32.xlu1 %v185_v28 }
 0x1e2   : > { %v187_v30 = vpop.xlane.xlu1 %186  ;;  %v191_v31 = vpop.xlane.xlu0 %190 }
 0x1e3   : > { %v188_v33 = vsel %vm184_vm8, %v187_v30, %v174_v26  ;;  %v192_v34 = vsel %vm184_vm8, %v191_v31, %v178_v25 }
 0x1e4   : > { %v199_v35 = vmul.f32 %v195_v32, %v188_v33  ;;  %v203_v36 = vmul.f32 %v195_v32, %v192_v34 }
 0x1e6   : > { %200 = vadd.xlane.f32.xlu1 %v199_v35  ;;  %204 = vadd.xlane.f32.xlu0 %v203_v36 }
 0x273   : > { %v201_v38 = vpop.xlane.xlu1 %200  ;;  %v205_v39 = vpop.xlane.xlu0 %204 }
 0x274   : > { %v202_v41 = vsel %vm198_vm9, %v201_v38, %v188_v33  ;;  %v206_v42 = vsel %vm198_vm9, %v205_v39, %v192_v34 }
 0x275   : > { %v213_v43 = vmul.f32 %v209_v40, %v202_v41  ;;  %v217_v44 = vmul.f32 %v209_v40, %v206_v42 }
 0x277   : > { %214 = vadd.xlane.f32.xlu1 %v213_v43  ;;  %218 = vadd.xlane.f32.xlu0 %v217_v44 }
 0x304   : > { %v215_v46 = vpop.xlane.xlu1 %214  ;;  %v219_v47 = vpop.xlane.xlu0 %218 }
 0x305   : > { %v216_v49 = vsel %vm212_vm10, %v215_v46, %v202_v41  ;;  %v220_v50 = vsel %vm212_vm10, %v219_v47, %v206_v42 }
 0x306   : > { %v227_v51 = vmul.f32 %v223_v48, %v216_v49  ;;  %v231_v52 = vmul.f32 %v223_v48, %v220_v50 }
 0x308   : > { %228 = vadd.xlane.f32.xlu1 %v227_v51  ;;  %232 = vadd.xlane.f32.xlu0 %v231_v52 }
 0x395   : > { %v229_v54 = vpop.xlane.xlu1 %228  ;;  %v233_v55 = vpop.xlane.xlu0 %232 }
 0x396   : > { %v230_v57 = vsel %vm226_vm11, %v229_v54, %v216_v49  ;;  %v234_v58 = vsel %vm226_vm11, %v233_v55, %v220_v50 }
 0x397   : > { %v241_v59 = vmul.f32 %v237_v56, %v230_v57  ;;  %v245_v60 = vmul.f32 %v237_v56, %v234_v58 }
 0x399   : > { %242 = vadd.xlane.f32.xlu1 %v241_v59  ;;  %246 = vadd.xlane.f32.xlu0 %v245_v60 }
 0x426   : > { %v243_v62 = vpop.xlane.xlu1 %242  ;;  %v247_v63 = vpop.xlane.xlu0 %246 }
 0x427   : > { %v244_v1 = vsel %vm240_vm12, %v243_v62, %v230_v57  ;;  %v248_v2 = vsel %vm240_vm12, %v247_v63, %v234_v58 }
 0x428   : > { %v255_v4 = vmul.f32 %v251_v0, %v244_v1  ;;  %v259_v5 = vmul.f32 %v251_v0, %v248_v2 }
 0x42a   : > { %256 = vadd.xlane.f32.xlu1 %v255_v4  ;;  %260 = vadd.xlane.f32.xlu0 %v259_v5 }
 0x42e   : > { %139 = vadd.xlane.f32.xlu1 %v138_v7 }
 0x4b7   : > { %v257_v12 = vpop.xlane.xlu1 %256  ;;  %v261_v13 = vpop.xlane.xlu0 %260 }
 0x4b8   : > { %v258_v15 = vsel %vm254_vm14, %v257_v12, %v244_v1  ;;  %v262_v16 = vsel %vm254_vm14, %v261_v13, %v248_v2 }
 0x4b9   : > { %v268_v17 = vmul.f32 %v264_v14, %v258_v15  ;;  %v272_v18 = vmul.f32 %v264_v14, %v262_v16 }
 0x4bb   : > { %269 = vadd.xlane.f32.xlu0 %v268_v17  ;;  %273 = vadd.xlane.f32.xlu1 %v272_v18  ;;  %v140_v19 = vpop.xlane.xlu1 %139 }
 0x4bc   : > { %443 = vrcp.f32 %v140_v19  ;;  %vm283_vm1 = vweird.f32 %v140_v19 }
 0x4c6   : > { %v444_v11 = vpop.eup %443 }
 0x548   : > { %v274_v20 = vpop.xlane.xlu1 %273  ;;  %v270_v21 = vpop.xlane.xlu0 %269 }
 0x549   : > { %v275_v22 = vsel %vm267_vm15, %v274_v20, %v262_v16  ;;  %v271_v23 = vsel %vm267_vm15, %v270_v21, %v258_v15 }
 0x54a   : > { %v282_v24 = vmul.f32 %v444_v11, %v275_v22  ;;  %v277_v25 = vmul.f32 %v519_v9, %v271_v23 }
 0x54c   : > { %v284_v26 = vsel %vm283_vm1, %v275_v22, %v282_v24  ;;  %v279_v27 = vsel %vm278_vm0, %v271_v23, %v277_v25 }
 0x54d   : > { %330 = vst [vmem:[%s297_s24 + $0x8] sm:$0xff] %v284_v26  ;;  %328 = vst [vmem:[%s297_s24] sm:$0xff] %v279_v27 }
 0x54e PF: > { %s7_s8 = sadd.s32 1, %s467_s8   ;;  %s556_s6 = smov %s463_s7 }
 0x54f   : > { %p4_p5 = scmp.ge.s32.totalorder %s7_s8, 4   ;;  %s557_s7 = smov %s559_s10 }
 0x551   :  { %6 = sbr.rel (!%p4_p5) target bundleno = 2 (0x2), region = 128 }

// kernel: forward.1
= control target key start
LH: loop header
LB: loop body
LE: loop exit
PB: predicated region body
PF: predicated region fallthrough
CT: control target
= control target key end

     0   :  { %s838_s12 = smov 0   ;;  %s840_s13 = smov 0   ;;  %s992_s0 = inlined_call_operand.vmem [shape: f32[2,8,128], index: 0, kind: input, shape index: {}]   ;;  %s993_s1 = inlined_call_operand.vmem [shape: f32[96,8], index: 1, kind: input, shape index: {}]   ;;  %s994_s2 = inlined_call_operand.vmem [shape: f32[2,8,128], index: 2, kind: input, shape index: {}]   ;;  %s995_s3 = inlined_call_operand.vmem [shape: f32[2,8,128], index: 3, kind: output, shape index: {}]  }
   0x1   :  { %s842_s14 = smov 0  }
   0x2 LB: > { %s25_s15 = sadd.s32 1, %s808_s13  ;;  %p627_p0 = scmp.ge.s32.totalorder %s812_s14, 1  ;;  %s812_s14 = sphi %s842_s14, %s13_s14   ;;  %s808_s13 = sphi %s840_s13, %s1001_s13   ;;  %s804_s12 = sphi %s838_s12, %s1000_s12  }
   0x3   : > { %p27_p1 = scmp.ge.s32.totalorder %s25_s15, 2  ;;  %p164_p2 = scmp.lt.s32.totalorder %s812_s14, 3 }
   0x5   : > { %s1003_s15 = smov (%p27_p1, %s25_s15), 0  ;;  %p165_p3 = pnand %p627_p0, %p164_p2 }
   0x6   : > { %p196_p4 = scmp.lt.s32.totalorder (!%p165_p3), %s804_s12, 1  ;;  %v214_v0 = vld [vmem:[%s993_s1] sm:$0xff] (!%p165_p3)  ;;  %vm233_vm0 = vcmask (!%p165_p3), 64512   ;;  %v215_v2 = vld [vmem:[%s993_s1 + $0x8] sm:$0xff] (!%p165_p3)  ;;  %v216_v3 = vld [vmem:[%s993_s1 + $0x10] sm:$0xff] (!%p165_p3)  ;;  %v814_v13 = vmov (!%p165_p3), 0.0|0.0   ;;  %v227_v39 = vlaneseq (!%p165_p3) }
   0x7   : > { %168 = sbr.rel (%p165_p3) target bundleno = 539 (0x21b), region = 32  ;;  %685 = vmatprep.mubr.msk.f32.mxu0 (!%p165_p3), %vm233_vm0, %v214_v0  ;;  %v217_v4 = vld [vmem:[%s993_s1 + $0x18] sm:$0xff] (!%p165_p3)  ;;  %v218_v5 = vld [vmem:[%s993_s1 + $0x20] sm:$0xff] (!%p165_p3)  ;;  %v219_v6 = vld [vmem:[%s993_s1 + $0x28] sm:$0xff] (!%p165_p3)  ;;  %738 = vmatprep.subr.bf16.mxu1 (!%p165_p3), %v814_v13  ;;  %vm815_vm1 = vmmov (!%p165_p3), 0   ;;  %v816_v14 = vmov (!%p165_p3), 0.0  }
   0x8   : > { %v220_v7 = vld [vmem:[%s993_s1 + $0x30] sm:$0xff] (!%p165_p3)  ;;  %v221_v8 = vld [vmem:[%s993_s1 + $0x38] sm:$0xff] (!%p165_p3)  ;;  %v222_v9 = vld [vmem:[%s993_s1 + $0x40] sm:$0xff] (!%p165_p3)  ;;  %735 = vmatprep.mubr.msk.f32.mxu1 (!%p165_p3), %vm815_vm1, %v816_v14  ;;  %v228_v42 = vshrl.u32 (!%p165_p3), %v227_v39, 7 }
   0x9   : > { %v223_v10 = vld [vmem:[%s993_s1 + $0x48] sm:$0xff] (!%p165_p3)  ;;  %v224_v11 = vld [vmem:[%s993_s1 + $0x50] sm:$0xff] (!%p165_p3)  ;;  %v225_v12 = vld [vmem:[%s993_s1 + $0x58] sm:$0xff] (!%p165_p3) }
   0xa   : > { %v229_v45 = vadd.s32 (!%p165_p3), 8, %v228_v42  ;;  %v230_v46 = vadd.s32 (!%p165_p3), 16, %v228_v42  ;;  %v231_v47 = vadd.s32 (!%p165_p3), 24, %v228_v42 }
   0xe   : > { %s1005_s12 = smov (!%p196_p4, %s804_s12), 1 }
   0xf   : > { %s860_s18 = sshll.u32 %s1005_s12, 3 }
  0x10   : > { %s202_s21 = scalar_lea.vmem %s992_s0, %s860_s18  ;;  %s206_s23 = scalar_lea.vmem %s994_s2, %s860_s18 }
  0x11   : > { %v232_v1 = vld [vmem:[%s202_s21] sm:$0xff]  ;;  %s213_s26 = scalar_lea.vmem %s995_s3, %s860_s18 }
  0x12   : > { %683 = vmatprep.subr.mxu0 %v232_v1 }
  0x13   : > { %684 = vmatpush3.msra.mxu0 %v232_v1 }
  0x14   : > { %686 = vmatmul.mubr.msk.f32.vlgmr.msra.gmra.mrb[0].mxu0 %vm233_vm0, %v215_v2 }
  0x15   : > { %688 = vmatprep.mubr.msk.f32.mxu0 %vm233_vm0, %v216_v3 }
  0x18   : > { %689 = vmatmul.mubr.msk.f32.gmra.mrb[2].mxu0 %vm233_vm0, %v217_v4 }
  0x19   : > { %691 = vmatprep.mubr.msk.f32.mxu0 %vm233_vm0, %v218_v5 }
  0x1c   : > { %692 = vmatmul.mubr.msk.f32.gmra.mrb[4].mxu0 %vm233_vm0, %v219_v6 }
  0x1d   : > { %694 = vmatprep.mubr.msk.f32.mxu0 %vm233_vm0, %v220_v7 }
  0x20   : > { %695 = vmatmul.mubr.msk.f32.gmra.mrb[6].mxu0 %vm233_vm0, %v221_v8 }
  0x21   : > { %697 = vmatprep.mubr.msk.f32.mxu0 %vm233_vm0, %v222_v9 }
  0x24   : > { %698 = vmatmul.mubr.msk.f32.gmra.mrb[8].mxu0 %vm233_vm0, %v223_v10 }
  0x25   : > { %700 = vmatprep.mubr.msk.f32.mxu0 %vm233_vm0, %v224_v11 }
  0x28   : > { %701 = vmatmul.mubr.msk.f32.gmra.mrb[10].mxu0 %vm233_vm0, %v225_v12 }
  0xe7   : > { %v912_v15 = vpop.f32.mrb[0].mxu0 }
  0xe8   : > { %v914_v16 = vpop.f32.mrb[1].mxu0 }
  0xeb   : > { %v916_v17 = vpop.f32.mrb[2].mxu0 }
  0xec   : > { %v918_v18 = vpop.f32.mrb[3].mxu0 }
  0xef   : > { %v920_v19 = vpop.f32.mrb[4].mxu0 }
  0xf0   : > { %v396_v20 = vmin.f32 %v912_v15, %v920_v19  ;;  %v924_v21 = vpop.f32.mrb[5].mxu0 }
  0xf1   : > { %v395_v22 = vmin.f32 %v914_v16, %v924_v21 }
  0xf3   : > { %v928_v23 = vpop.f32.mrb[6].mxu0 }
  0xf4   : > { %v398_v24 = vmin.f32 %v916_v17, %v928_v23  ;;  %v366_v25 = vpop.f32.mrb[7].mxu0 }
  0xf5   : > { %v397_v26 = vmin.f32 %v918_v18, %v366_v25 }
  0xf7   : > { %v933_v27 = vpop.f32.mrb[8].mxu0 }
  0xf8   : > { %v400_v28 = vmin.f32 %v396_v20, %v933_v27  ;;  %v936_v29 = vpop.f32.mrb[9].mxu0  ;;  %v817_v20 = vmov 1.0|1.0  }
  0xf9   : > { %v399_v30 = vmin.f32 %v395_v22, %v936_v29 }
  0xfb   : > { %v403_v31 = vmax.f32 %v399_v30, %v400_v28  ;;  %v702_v32 = vpop.f32.mrb[10].mxu0 }
  0xfc   : > { %v402_v33 = vmin.f32 %v398_v24, %v702_v32  ;;  %v386_v34 = vpop.f32.mrb[11].mxu0 }
  0xfd   : > { %v401_v35 = vmin.f32 %v397_v26, %v386_v34 }
  0xff   : > { %v404_v36 = vmax.f32 %v401_v35, %v402_v33 }
 0x101   : > { %v405_v37 = vmax.f32 %v403_v31, %v404_v36 }
 0x103   : > { %v406_v38 = vrot.slane %v405_v37, 4 }
 0x105   : > { %v407_v40 = vmax.f32 %v405_v37, %v406_v38 }
 0x107   : > { %v408_v41 = vrot.slane %v407_v40, 2 }
 0x109   : > { %v409_v43 = vmax.f32 %v407_v40, %v408_v41 }
 0x10b   : > { %v410_v44 = vrot.slane %v409_v43, 1 }
 0x10d   : > { %v411_v48 = vmax.f32 %v409_v43, %v410_v44 }
 0x10f   : > { %vm412_vm2 = vcmp.eq.f32.partialorder %v399_v30, %v411_v48  ;;  %vm413_vm3 = vcmp.eq.f32.partialorder %v400_v28, %v411_v48  ;;  %vm414_vm4 = vcmp.eq.f32.partialorder %v401_v35, %v411_v48  ;;  %vm415_vm5 = vcmp.eq.f32.partialorder %v402_v33, %v411_v48 }
 0x110   : > { %v416_v49 = vsel %vm412_vm2, %v228_v42, 32  ;;  %v417_v50 = vsel %vm413_vm3, %v229_v45, 32  ;;  %v418_v51 = vsel %vm414_vm4, %v230_v46, 32  ;;  %v419_v52 = vsel %vm415_vm5, %v231_v47, 32 }
 0x111   : > { %vm420_vm6 = vcmp.lt.s32.totalorder %v416_v49, %v417_v50  ;;  %vm422_vm7 = vcmp.lt.s32.totalorder %v418_v51, %v419_v52  ;;  %vm435_vm12 = vcmp.ge.f32.partialorder %v411_v48, -0.001 }
 0x112   : > { %v421_v53 = vsel %vm420_vm6, %v416_v49, %v417_v50  ;;  %v423_v54 = vsel %vm422_vm7, %v418_v51, %v419_v52 }
 0x113   : > { %vm424_vm8 = vcmp.lt.s32.totalorder %v421_v53, %v423_v54 }
 0x114   : > { %v425_v55 = vsel %vm424_vm8, %v421_v53, %v423_v54 }
 0x115   : > { %v426_v56 = vrot.slane %v425_v55, 4 }
 0x117   : > { %vm427_vm9 = vcmp.lt.s32.totalorder %v425_v55, %v426_v56 }
 0x118   : > { %v428_v57 = vsel %vm427_vm9, %v425_v55, %v426_v56 }
 0x119   : > { %v429_v58 = vrot.slane %v428_v57, 2 }
 0x11b   : > { %vm430_vm10 = vcmp.lt.s32.totalorder %v428_v57, %v429_v58 }
 0x11c   : > { %v431_v59 = vsel %vm430_vm10, %v428_v57, %v429_v58 }
 0x11d   : > { %v432_v60 = vrot.slane %v431_v59, 1 }
 0x11f   : > { %vm433_vm11 = vcmp.lt.s32.totalorder %v431_v59, %v432_v60 }
 0x120   : > { %v434_v61 = vsel %vm433_vm11, %v431_v59, %v432_v60 }
 0x121   : > { %vm438_vm13 = vcmp.eq.s32.totalorder %v230_v46, %v434_v61  ;;  %vm439_vm14 = vcmp.eq.s32.totalorder %v231_v47, %v434_v61  ;;  %vm436_vm15 = vcmp.eq.s32.totalorder %v228_v42, %v434_v61  ;;  %vm437_vm1 = vcmp.eq.s32.totalorder %v229_v45, %v434_v61 }
 0x122   : > { %vm939_vm0 = vmand %vm438_vm13, %vm435_vm12 }
 0x123   : > { %vm943_vm2 = vmand %vm439_vm14, %vm435_vm12  ;;  %v645_v0 = vsel %vm939_vm0, 1.0, %v816_v14 }
 0x124   : > { %v646_v1 = vsel %vm943_vm2, 1.0, %v816_v14  ;;  %v456_v2 = vmul.f32 %v645_v0, %v918_v18  ;;  %v460_v3 = vmul.f32 %v645_v0, %v366_v25  ;;  %v464_v4 = vmul.f32 %v645_v0, %v386_v34  ;;  %vm442_vm3 = vmand %vm436_vm15, %vm435_vm12 }
 0x125   : > { %v465_v5 = vmul.f32 %v702_v32, %v646_v1  ;;  %vm443_vm4 = vmand %vm437_vm1, %vm435_vm12  ;;  %v643_v6 = vsel %vm442_vm3, 1.0, %v816_v14  ;;  %v457_v7 = vmul.f32 %v916_v17, %v646_v1  ;;  %v461_v8 = vmul.f32 %v928_v23, %v646_v1 }
 0x126   : > { %v644_v9 = vsel %vm443_vm4, 1.0, %v816_v14  ;;  %vm739_vm5 = vmpackc.low %vm443_vm4, %vm442_vm3  ;;  %v454_v10 = vmul.f32 %v643_v6, %v914_v16  ;;  %v458_v11 = vmul.f32 %v643_v6, %v924_v21  ;;  %v462_v12 = vmul.f32 %v643_v6, %v936_v29 }
 0x127   : > { %v760_v18 = vpack.c.bf16 %v465_v5, %v464_v4  ;;  %740 = vmatpush3.bf16.msk.msra.mxu1 %vm739_vm5, %v817_v20  ;;  %vm742_vm6 = vmpackc.low %vm943_vm2, %vm939_vm0  ;;  %v455_v17 = vmul.f32 %v912_v15, %v644_v9  ;;  %v748_v22 = vpack.c.bf16 %v457_v7, %v456_v2  ;;  %v459_v14 = vmul.f32 %v920_v19, %v644_v9  ;;  %v226_v15 = vld [vmem:[%s206_s23] sm:$0xff] }
 0x128   : > { %741 = vmatprep.subr.bf16.mxu1 %v814_v13  ;;  %v754_v16 = vpack.c.bf16 %v461_v8, %v460_v3  ;;  %v463_v21 = vmul.f32 %v933_v27, %v644_v9 }
 0x129   : > { %v745_v23 = vpack.c.bf16 %v455_v17, %v454_v10  ;;  %v751_v24 = vpack.c.bf16 %v459_v14, %v458_v11 }
 0x12a   : > { %v757_v25 = vpack.c.bf16 %v463_v21, %v462_v12 }
 0x12b   : > { %743 = vmatpush3.bf16.msk.msra.mxu1 %vm742_vm6, %v817_v20 }
 0x12c   : > { %744 = vmatprep.subr.bf16.mxu1 %v814_v13 }
 0x12f   : > { %746 = vmatpush3.bf16.msra.mxu1 %v745_v23 }
 0x130   : > { %747 = vmatprep.subr.bf16.mxu1 %v814_v13 }
 0x133   : > { %749 = vmatpush3.bf16.msra.mxu1 %v748_v22 }
 0x134   : > { %750 = vmatprep.subr.bf16.mxu1 %v814_v13 }
 0x137   : > { %752 = vmatpush3.bf16.msra.mxu1 %v751_v24 }
 0x138   : > { %753 = vmatprep.subr.bf16.mxu1 %v814_v13 }
 0x13b   : > { %755 = vmatpush3.bf16.msra.mxu1 %v754_v16 }
 0x13c   : > { %756 = vmatprep.subr.bf16.mxu1 %v814_v13 }
 0x13f   : > { %758 = vmatpush3.bf16.msra.mxu1 %v757_v25 }
 0x140   : > { %759 = vmatprep.subr.bf16.mxu1 %v814_v13 }
 0x143   : > { %761 = vmatpush3.bf16.msra.mxu1 %v760_v18 }
 0x146   : > { %736 = vmatmul.mubr.f32.vlgmr.msra.gmra.mrb[0].mxu1 %v226_v15 }
 0x219   : > { %v532_v19 = vpop.f32.mrb[0].mxu1 }
 0x21a   : > { %536 = vst [vmem:[%s213_s26] sm:$0xff] %v532_v19  ;;  %v737_v26 = vpop.f32.mrb[1].mxu1 }
 0x21b PF: > { %s13_s14 = sadd.s32 1, %s812_s14   ;;  %s1000_s12 = smov %s808_s13 }
 0x21c   : > { %p10_p5 = scmp.ge.s32.totalorder %s13_s14, 4   ;;  %s1001_s13 = smov %s1003_s15 }
 0x21e   :  { %12 = sbr.rel (!%p10_p5) target bundleno = 2 (0x2), region = 65 }

</bundles_post_ra>
